<compile_context>
chip_gen: v7x
topology: tpu7x:2x2x1
jax: 0.10.0
libtpu: 0.0.40
codegen_flags: <defaults>
</compile_context>

<pallas_src>
import jax
import jax.numpy as jnp
from jax.experimental import pallas as pl
from jax.experimental.pallas import tpu as pltpu


def time_encoding_kernel(x_ref, t_ref, o_ref):
    # (tile_rows, D) + (tile_rows, 1) lane-broadcast add; f32 math, cast only at store.
    o_ref[...] = (x_ref[...].astype(jnp.float32) + t_ref[...]).astype(o_ref.dtype)


def _round_up(n, m):
    return ((n + m - 1) // m) * m


def _choose_tile_rows(R, row_bytes, itemsize, target_block_bytes):
    """Row-tile for the flattened (R, D) stream.

    Multiple of the sublane-packing step (8 f32 / 16 bf16 / 32 int8), capped by the
    per-block byte budget, and nudged so the grid-step count is even (>= 2) so the
    'parallel' axis splits evenly across v7x's two TensorCores.  No divisibility
    requirement on R: pl.cdiv handles the ragged last block.
    """
    step = 8 * max(1, 4 // max(1, itemsize))
    if R <= step:
        return R                                        # single full-extent block
    budget_rows = max(step, (target_block_bytes // max(1, row_bytes)) // step * step)
    tile = min(budget_rows, _round_up(R, step))
    if tile >= R:
        # Would be a single step: split in two so both v7x TCs get work.
        half = _round_up(pl.cdiv(R, 2), step)
        if step <= half < R:
            tile = half
    else:
        steps = pl.cdiv(R, tile)
        if steps % 2 == 1:
            even = _round_up(pl.cdiv(R, steps + 1), step)
            if even >= step:
                tile = min(tile, even)                  # best-effort even step count
    return tile


def _time_row_table(x, mask, lengths):
    """Tiny [T*B, 1] f32 table: time[t*B + b] = mask[b, t] * t / (lengths[b] - 1)."""
    T, B, _ = x.shape
    inv = 1.0 / (lengths.astype(jnp.float32) - 1.0)                       # [B]
    t_idx = jnp.arange(T, dtype=jnp.float32)[:, None]                     # [T, 1]
    time_tb = mask.astype(jnp.float32).T * inv[None, :] * t_idx           # [T, B]
    return time_tb.reshape(T * B, 1)                                      # [T*B, 1] f32


def time_encoding(x, mask, lengths, *, target_block_bytes=4 << 20,
                  min_elems_for_pallas=1 << 15):
    """x: [T, B, D], mask: [B, T], lengths: [B].  Returns x + time broadcast (eval mode).

    For the Pallas path to avoid a defensive copy of x, the caller should donate x
    (e.g. jax.jit(time_encoding, donate_argnums=0)).
    """
    T, B, D = x.shape
    R = T * B
    time_row = _time_row_table(x, mask, lengths)                          # [R, 1] f32

    if x.size < min_elems_for_pallas:
        # Small-problem bypass: launch + per-step overhead would dominate; let XLA fuse.
        out = (x.reshape(R, D).astype(jnp.float32) + time_row).astype(x.dtype)
        return out.reshape(T, B, D)

    x2 = x.reshape(R, D)                                                  # lane-dense rows
    itemsize = jnp.dtype(x.dtype).itemsize
    tile_rows = _choose_tile_rows(R, D * itemsize, itemsize, target_block_bytes)
    grid = (pl.cdiv(R, tile_rows),)

    out2 = pl.pallas_call(
        time_encoding_kernel,
        out_shape=jax.ShapeDtypeStruct((R, D), x.dtype),
        grid_spec=pltpu.PrefetchScalarGridSpec(
            num_scalar_prefetch=0,
            grid=grid,
            in_specs=[
                pl.BlockSpec((tile_rows, D), lambda i: (i, 0)),           # x rows
                pl.BlockSpec((tile_rows, 1), lambda i: (i, 0)),           # per-row time
            ],
            out_specs=pl.BlockSpec((tile_rows, D), lambda i: (i, 0)),
        ),
        compiler_params=pltpu.CompilerParams(
            dimension_semantics=("parallel",),
            vmem_limit_bytes=32 << 20,          # safe on v5e/v6e (128 MiB) and v7x (64 MiB)
        ),
        cost_estimate=pl.CostEstimate(
            flops=R * D,
            transcendentals=0,
            bytes_accessed=2 * R * D * itemsize + R * 4,
        ),
        input_output_aliases={0: 0},            # out reuses x's HBM buffer (needs donation)
    )(x2, time_row)

    # TODO(synk): training-mode dropout (p=0.1) not implemented; eval-mode dropout is identity.
    return out2.reshape(T, B, D)


def time_encoding_ref(x, mask, lengths):
    # Pure-JAX reference mirroring the PyTorch forward (eval mode); ramp in f32 to avoid
    # bf16 integer-ramp precision loss for large T.
    time = mask.astype(jnp.float32) * (1.0 / (lengths.astype(jnp.float32)[..., None] - 1.0))
    T = time.shape[1]
    time = time[:, None] * jnp.arange(T, dtype=jnp.float32)[None, :]      # [B, 1, T]
    time = time[:, 0].T                                                   # [T, B]
    return (x.astype(jnp.float32) + time[..., None]).astype(x.dtype)


if __name__ == "__main__":
    key = jax.random.PRNGKey(0)

    # Small but lane-dense test shape: d_model = 128 keeps the output stores unmasked.
    T, B, D = 16, 2, 128
    x = jax.random.normal(key, (T, B, D), dtype=jnp.float32)
    lengths = jnp.array([16.0, 11.0], dtype=jnp.float32)                  # [B]
    t_range = jnp.arange(T, dtype=jnp.float32)[None, :]                   # [1, T]
    mask = (t_range < lengths[:, None]).astype(jnp.float32)               # [B, T]

    # Reference first (x's buffer is donated to the kernel call below).
    ref = jax.block_until_ready(time_encoding_ref(x, mask, lengths))

    # Donate x so input_output_aliases={0: 0} is honored (no defensive copy).
    run = jax.jit(
        lambda xx, mm, ll: time_encoding(xx, mm, ll, min_elems_for_pallas=0),
        donate_argnums=0,
    )
    out = jax.block_until_ready(run(x, mask, lengths))

    assert out.shape == (T, B, D)
    assert jnp.allclose(out, ref, atol=1e-5, rtol=1e-5)

    print("KERNEL_OK")
</pallas_src>

<mosaic_0001>
module attributes {stable_mosaic.version = 11 : i64} {
  func.func @time_encoding_kernel(%arg0: i32, %arg1: memref<16x128xf32, #tpu.memory_space<vmem>>, %arg2: memref<16x1xf32, #tpu.memory_space<vmem>>, %arg3: memref<16x128xf32, #tpu.memory_space<vmem>>) attributes {dimension_semantics = [#tpu.dimension_semantics<parallel>], iteration_bounds = array<i64: 2>, scalar_prefetch = 0 : i64, scratch_operands = 0 : i64, tpu.core_type = #tpu.core_type<tc>, window_params = [{transform_indices = @transform_0, window_bounds = array<i64: 16, 128>}, {transform_indices = @transform_1, window_bounds = array<i64: 16, 1>}, {transform_indices = @transform_2, window_bounds = array<i64: 16, 128>}]} {
    %c0 = arith.constant 0 : index
    %c0_0 = arith.constant 0 : index
    %0 = vector.load %arg1[%c0, %c0_0] : memref<16x128xf32, #tpu.memory_space<vmem>>, vector<16x128xf32>
    %c0_1 = arith.constant 0 : index
    %c0_2 = arith.constant 0 : index
    %1 = vector.load %arg2[%c0_1, %c0_2] : memref<16x1xf32, #tpu.memory_space<vmem>>, vector<16x1xf32>
    %2 = vector.broadcast %1 : vector<16x1xf32> to vector<16x128xf32>
    %3 = arith.addf %0, %2 : vector<16x128xf32>
    %c0_3 = arith.constant 0 : index
    %c0_4 = arith.constant 0 : index
    %4 = vector.load %arg3[%c0_3, %c0_4] : memref<16x128xf32, #tpu.memory_space<vmem>>, vector<16x128xf32>
    tpu.vector_store %arg3[%c0_3, %c0_4], %3 {strides = array<i32>} : memref<16x128xf32, #tpu.memory_space<vmem>>, vector<16x128xf32>,
    return
  }
  func.func @transform_0(%arg0: i32) -> (i32, i32) {
    %c0_i32 = arith.constant 0 : i32
    %c0_i32_0 = arith.constant 0 : i32
    return %arg0, %c0_i32 : i32, i32
  }
  func.func @transform_1(%arg0: i32) -> (i32, i32) {
    %c0_i32 = arith.constant 0 : i32
    %c0_i32_0 = arith.constant 0 : i32
    return %arg0, %c0_i32 : i32, i32
  }
  func.func @transform_2(%arg0: i32) -> (i32, i32) {
    %c0_i32 = arith.constant 0 : i32
    %c0_i32_0 = arith.constant 0 : i32
    return %arg0, %c0_i32 : i32, i32
  }
}

</mosaic_0001>

<bundles_post_ra>
// kernel: _lambda_.1
= control target key start
LH: loop header
LB: loop body
LE: loop exit
PB: predicated region body
PF: predicated region fallthrough
CT: control target
= control target key end

     0   :  { %s302_s9 = smov 0   ;;  %s322_s0 = inlined_call_operand.vmem [shape: f32[32,128], index: 0, kind: input, shape index: {}, may-alias: {0,2}]   ;;  %s323_s1 = inlined_call_operand.vmem [shape: f32[32,1], index: 1, kind: input, shape index: {}]   ;;  %s324_s2 = inlined_call_operand.vmem [shape: f32[32,128], index: 2, kind: output, shape index: {}, may-alias: {0,2}]  }
   0x1 LB: > { %s255_s10 = sadd.s32 4294967295, %s284_s9   ;;  %p259_p0 = scmp.ge.s32.totalorder %s284_s9, 1  ;;  %s284_s9 = sphi %s302_s9, %s12_s9  }
   0x2   : > { %p124_p1 = scmp.lt.s32.totalorder %s284_s9, 3 }
   0x4   : > { %p125_p2 = pnand %p259_p0, %p124_p1 }
   0x5   : > { %s260_s11 = sshll.u32 (!%p125_p2), %s255_s10, 1  ;;  %v286_v0 = vmov (!%p125_p2), 0  }
   0x6   : > { %128 = sbr.rel (%p125_p2) target bundleno = 152 (0x98), region = 28  ;;  %277 = vset.pattern.permute.xlu0 (!%p125_p2), %v286_v0  ;;  %p152_p3 = scmp.lt.s32.totalorder (!%p125_p2), %s260_s11, 3 }
   0xd   : > { %s326_s11 = smov (!%p152_p3, %s260_s11), 3 }
   0xe   : > { %s261_s12 = sshll.u32 %s326_s11, 3 }
   0xf   : > { %s161_s15 = scalar_lea.vmem %s323_s1, %s261_s12  ;;  %s155_s18 = scalar_lea.vmem %s322_s0, %s261_s12 }
  0x10   : > { %v171_v1 = vld [vmem:[%s161_s15] sm:$0xff]  ;;  %v172_v2 = vld [vmem:[%s161_s15 + $0x8] sm:$0xff]  ;;  %s167_s21 = scalar_lea.vmem %s324_s2, %s261_s12 }
  0x11   : > { %175 = vperm.xlu0 %277, %v171_v1   ;;  %v169_v3 = vld [vmem:[%s155_s18] sm:$0xff]  ;;  %v170_v5 = vld [vmem:[%s155_s18 + $0x8] sm:$0xff] }
  0x15   : > { %180 = vperm.xlu0 %277, %v172_v2  }
  0x90   : > { %v176_v4 = vpop.permute.xlu0 %175 }
  0x91   : > { %v183_v6 = vadd.f32 %v176_v4, %v169_v3 }
  0x93   : > { %185 = vst [vmem:[%s167_s21] sm:$0xff] %v183_v6 }
  0x94   : > { %v181_v7 = vpop.permute.xlu0 %180 }
  0x95   : > { %v184_v8 = vadd.f32 %v181_v7, %v170_v5 }
  0x97   : > { %186 = vst [vmem:[%s167_s21 + $0x8] sm:$0xff] %v184_v8 }
  0x98 PF: > { %s12_s9 = sadd.s32 1, %s284_s9  }
  0x99   : > { %p9_p4 = scmp.ge.s32.totalorder %s12_s9, 4  }
  0x9b   :  { %11 = sbr.rel (!%p9_p4) target bundleno = 1 (0x1), region = 61 }

</bundles_post_ra>
